<compile_context>
chip_gen: v7x
topology: tpu7x:2x2x1
jax: 0.10.0
libtpu: 0.0.40
codegen_flags: <defaults>
</compile_context>

<pallas_src>
import functools
import math

import jax
import jax.numpy as jnp
from jax.experimental import pallas as pl
from jax.experimental.pallas import tpu as pltpu


# ---------------------------------------------------------------------------
# Fused kernel: embed (layer 0 only) + one EncoderLayer per grid step.
# ---------------------------------------------------------------------------
def fused_encoder_kernel(
    x_ref, pos_ref, mask_ref, wqkv_ref, wo_ref, w1_ref, w2_ref, pk_ref,
    o_ref, act_ref, *, n_heads, head_dim, emb_scale,
):
    layer = pl.program_id(0)

    # Encoder prologue (layer 0 only): src = x * sqrt(H) + pos_embedding.
    # (Dropout layers are inference-mode identity.)
    @pl.when(layer == 0)
    def _():
        act_ref[...] = x_ref[...] * emb_scale + pos_ref[...]

    src = act_ref[...]                         # [M, H], VMEM-resident across layers
    M, H = src.shape
    PF = w1_ref.shape[-1]

    # Packed per-layer small vectors (one DMA stream):
    # rows = [b1 | bq | bk | bv | bo | gamma | beta | b2], padded to max(H, PF).
    pk = pk_ref[...]
    b1 = pk[0:1, :PF]
    bq, bk, bv = pk[1:2, :H], pk[2:3, :H], pk[3:4, :H]
    bo, gamma, beta, b2 = pk[4:5, :H], pk[5:6, :H], pk[6:7, :H], pk[7:8, :H]

    # ---- fused QKV projection: one [M,H] x [H,3H] MXU matmul ----
    qkv = jnp.dot(src, wqkv_ref[...], preferred_element_type=jnp.float32)   # [M, 3H]
    q = qkv[:, 0:H] + bq
    k = qkv[:, H:2 * H] + bk
    v = qkv[:, 2 * H:3 * H] + bv

    # Stack heads along the sublane axis -> [n_heads*M, head_dim] so that QK^T,
    # softmax and PV each run ONCE for all heads and all batch elements.
    def stack_heads(t):
        return jnp.concatenate(
            [t[:, h * head_dim:(h + 1) * head_dim] for h in range(n_heads)], axis=0)

    q_s, k_s, v_s = stack_heads(q), stack_heads(k), stack_heads(v)

    # Single QK^T (contraction over head_dim, no materialised transpose).
    s = jax.lax.dot_general(q_s, k_s, (((1,), (1,)), ((), ())),
                            preferred_element_type=jnp.float32)   # [NH*M, NH*M]
    # Scale scores (same op order as torch: energy / sqrt(head_dim)), then mask
    # cross-head / cross-batch pairs with the precomputed additive mask.
    s = s * (1.0 / math.sqrt(head_dim)) + mask_ref[...]
    s = s - jnp.max(s, axis=-1, keepdims=True)
    p = jnp.exp(s)
    p = p / jnp.sum(p, axis=-1, keepdims=True)     # exact softmax normalisation

    # Single PV matmul for all heads, then put heads back onto lanes.
    ctx_s = jnp.dot(p, v_s, preferred_element_type=jnp.float32)   # [NH*M, head_dim]
    ctx = jnp.concatenate(
        [ctx_s[h * M:(h + 1) * M, :] for h in range(n_heads)], axis=-1)     # [M, H]

    # Single output projection (replaces per-head Wo row-slice accumulation).
    attn = jnp.dot(ctx, wo_ref[...], preferred_element_type=jnp.float32) + bo

    # PyTorch LayerNorm (shared module for both residuals): biased var, eps=1e-5.
    def layer_norm(y):
        mu = jnp.mean(y, axis=-1, keepdims=True)
        var = jnp.mean((y - mu) ** 2, axis=-1, keepdims=True)
        return (y - mu) * jax.lax.rsqrt(var + 1e-5) * gamma + beta

    y = layer_norm(src + attn)

    # ---- position-wise feed-forward ----
    h1 = jnp.maximum(
        jnp.dot(y, w1_ref[...], preferred_element_type=jnp.float32) + b1, 0.0)
    h2 = jnp.dot(h1, w2_ref[...], preferred_element_type=jnp.float32) + b2

    new_src = layer_norm(y + h2)
    act_ref[...] = new_src       # carry to the next layer (persistent VMEM scratch)
    o_ref[...] = new_src         # constant out-block index -> one HBM writeback


# ---------------------------------------------------------------------------
# Parameter construction (deterministic, synthetic) and stacking
# ---------------------------------------------------------------------------
def make_params(key, num_layers, H, n_heads, pf, length):
    keys = jax.random.split(key, 1 + num_layers)
    pos_emb = jax.random.normal(keys[0], (length, H), jnp.float32) * 0.1
    layers = []
    for li in range(num_layers):
        ks = jax.random.split(keys[1 + li], 16)

        def lin(kw, kb, din, dout):
            w = jax.random.normal(kw, (din, dout), jnp.float32) * (1.0 / math.sqrt(din))
            b = jax.random.normal(kb, (1, dout), jnp.float32) * 0.01
            return w, b

        wq, bq = lin(ks[0], ks[1], H, H)
        wk, bk = lin(ks[2], ks[3], H, H)
        wv, bv = lin(ks[4], ks[5], H, H)
        wo, bo = lin(ks[6], ks[7], H, H)
        gamma = jnp.ones((1, H), jnp.float32)
        beta = jnp.zeros((1, H), jnp.float32)
        w1, b1 = lin(ks[8], ks[9], H, pf)
        w2, b2 = lin(ks[10], ks[11], pf, H)
        layers.append((wq, bq, wk, bk, wv, bv, wo, bo, gamma, beta, w1, b1, w2, b2))
    return pos_emb, layers


def stack_params(layers):
    # Note: at real sizes, store these stacks as bf16 (halves weight DMA bytes,
    # native MXU rate) and cast activations at the dots; kept f32 at toy size.
    wqkv_s, wo_s, w1_s, w2_s, pk_s = [], [], [], [], []
    for (wq, bq, wk, bk, wv, bv, wo, bo, gamma, beta, w1, b1, w2, b2) in layers:
        H = wq.shape[0]
        PF = w1.shape[1]
        PV = max(H, PF)

        def pad(v):
            return jnp.pad(v, ((0, 0), (0, PV - v.shape[1])))

        wqkv_s.append(jnp.concatenate([wq, wk, wv], axis=1))                 # [H, 3H]
        wo_s.append(wo)
        w1_s.append(w1)
        w2_s.append(w2)
        # One packed small-vector stream per layer (review item 8).
        pk_s.append(jnp.concatenate(
            [pad(b1), pad(bq), pad(bk), pad(bv), pad(bo),
             pad(gamma), pad(beta), pad(b2)], axis=0))                       # [8, PV]
    return (jnp.stack(wqkv_s), jnp.stack(wo_s), jnp.stack(w1_s),
            jnp.stack(w2_s), jnp.stack(pk_s))


# ---------------------------------------------------------------------------
# Full encoder forward: ONE pallas_call, grid over layers.
# ---------------------------------------------------------------------------
def encoder_forward(x, pos_emb, layers, n_heads):
    B, S, H = x.shape
    L = len(layers)
    M = B * S
    head_dim = H // n_heads
    wqkv, wo, w1, w2, pk = stack_params(layers)
    PF = w1.shape[-1]
    PV = pk.shape[-1]
    R = n_heads * M                                  # stacked-head score dim

    x_flat = x.reshape(M, H)
    pos_flat = jnp.tile(pos_emb[:S], (B, 1))         # pos = arange(S), per batch row

    # Additive mask for the stacked-head layout (hoisted out of the kernel):
    # query row (head h, flat row m) may only attend to keys with the same head
    # AND the same batch element (batch was folded into the M dimension).
    rows = jnp.arange(R)
    head_of = rows // M
    batch_of = (rows % M) // S
    same = (head_of[:, None] == head_of[None, :]) & \
           (batch_of[:, None] == batch_of[None, :])
    neg_mask = jnp.where(same, 0.0, -1e30).astype(jnp.float32)

    kernel = functools.partial(
        fused_encoder_kernel, n_heads=n_heads, head_dim=head_dim,
        emb_scale=math.sqrt(H))

    flops_per_layer = (2 * M * H * 3 * H            # QKV
                       + 2 * R * R * head_dim * 2   # QK^T + PV
                       + 2 * M * H * H              # Wo
                       + 2 * M * H * PF * 2)        # FFN
    weight_bytes = sum(int(a.size) * 4 for a in (wqkv, wo, w1, w2, pk))
    io_bytes = 4 * int(x_flat.size + pos_flat.size + neg_mask.size + M * H)
    cost = pl.CostEstimate(flops=L * flops_per_layer,
                           transcendentals=L * R * R,
                           bytes_accessed=weight_bytes + io_bytes)

    out = pl.pallas_call(
        kernel,
        grid=(L,),
        in_specs=[
            pl.BlockSpec((M, H), lambda l: (0, 0)),               # x (flattened)
            pl.BlockSpec((M, H), lambda l: (0, 0)),               # pos embedding
            pl.BlockSpec((R, R), lambda l: (0, 0)),               # attention mask
            pl.BlockSpec((None, H, 3 * H), lambda l: (l, 0, 0)),  # Wqkv
            pl.BlockSpec((None, H, H), lambda l: (l, 0, 0)),      # Wo
            pl.BlockSpec((None, H, PF), lambda l: (l, 0, 0)),     # W1
            pl.BlockSpec((None, PF, H), lambda l: (l, 0, 0)),     # W2
            pl.BlockSpec((None, 8, PV), lambda l: (l, 0, 0)),     # packed vectors
        ],
        out_specs=pl.BlockSpec((M, H), lambda l: (0, 0)),
        out_shape=jax.ShapeDtypeStruct((M, H), jnp.float32),
        scratch_shapes=[pltpu.VMEM((M, H), jnp.float32)],         # activation carry
        compiler_params=pltpu.CompilerParams(
            dimension_semantics=("arbitrary",)),   # layer axis carries the activation
        cost_estimate=cost,
    )(x_flat, pos_flat, neg_mask, wqkv, wo, w1, w2, pk)
    return out.reshape(B, S, H)


# ---------------------------------------------------------------------------
# Pure-JAX reference (for correctness check)
# ---------------------------------------------------------------------------
def reference_forward(x, pos_emb, layers, n_heads):
    B, S, H = x.shape
    hd = H // n_heads
    src = x * math.sqrt(H) + pos_emb[:S][None]
    for (wq, bq, wk, bk, wv, bv, wo, bo, gamma, beta, w1, b1, w2, b2) in layers:
        q = (src @ wq + bq).reshape(B, S, n_heads, hd).transpose(0, 2, 1, 3)
        k = (src @ wk + bk).reshape(B, S, n_heads, hd).transpose(0, 2, 1, 3)
        v = (src @ wv + bv).reshape(B, S, n_heads, hd).transpose(0, 2, 1, 3)
        e = jnp.einsum("bhqd,bhkd->bhqk", q, k) / math.sqrt(hd)
        a = jax.nn.softmax(e, axis=-1)
        o = jnp.einsum("bhqk,bhkd->bhqd", a, v).transpose(0, 2, 1, 3).reshape(B, S, H)
        o = o @ wo + bo

        def ln(y):
            mu = jnp.mean(y, axis=-1, keepdims=True)
            var = jnp.mean((y - mu) ** 2, axis=-1, keepdims=True)
            return (y - mu) * jax.lax.rsqrt(var + 1e-5) * gamma + beta

        y = ln(src + o)
        f = jnp.maximum(y @ w1 + b1, 0.0) @ w2 + b2
        src = ln(y + f)
    return src


if __name__ == "__main__":
    # config: hidden_size=32, num_layers=2, n_heads=4, pf_size=64, length=16
    B, S, H, NH, PF, LEN, NLAYERS = 2, 8, 32, 4, 64, 16, 2

    key = jax.random.PRNGKey(0)
    kx, kp = jax.random.split(key)
    x = jax.random.normal(kx, (B, S, H), jnp.float32)
    pos_emb, layers = make_params(kp, NLAYERS, H, NH, PF, LEN)

    out = jax.block_until_ready(encoder_forward(x, pos_emb, layers, NH))
    ref = reference_forward(x, pos_emb, layers, NH)

    assert out.shape == (B, S, H)
    # Kernel and reference perform identical per-element math (scores scaled the
    # same way, exact softmax, masked columns contribute exact zeros).  Residual
    # differences come only from backend matmul precision (TPU default matmul
    # precision truncates f32 operands to bf16; Mosaic and XLA may pick different
    # matmul algorithms).  Post-LayerNorm outputs are O(1), so a 2e-2 absolute
    # bound is far below any structural error while covering precision noise.
    err = float(jnp.max(jnp.abs(out - ref)))
    assert err < 2e-2, f"mismatch vs reference (max abs err = {err:.3e})"
    print("KERNEL_OK")
</pallas_src>

<mosaic_0001>
module attributes {stable_mosaic.version = 11 : i64} {
  func.func @fused_encoder_kernel(%arg0: i32, %arg1: memref<16x32xf32, #tpu.memory_space<vmem>>, %arg2: memref<16x32xf32, #tpu.memory_space<vmem>>, %arg3: memref<64x64xf32, #tpu.memory_space<vmem>>, %arg4: memref<1x32x96xf32, #tpu.memory_space<vmem>>, %arg5: memref<1x32x32xf32, #tpu.memory_space<vmem>>, %arg6: memref<1x32x64xf32, #tpu.memory_space<vmem>>, %arg7: memref<1x64x32xf32, #tpu.memory_space<vmem>>, %arg8: memref<1x8x64xf32, #tpu.memory_space<vmem>>, %arg9: memref<16x32xf32, #tpu.memory_space<vmem>>, %arg10: memref<16x32xf32, #tpu.memory_space<vmem>>) attributes {dimension_semantics = [#tpu.dimension_semantics<arbitrary>], iteration_bounds = array<i64: 2>, scalar_prefetch = 0 : i64, scratch_operands = 1 : i64, tpu.core_type = #tpu.core_type<tc>, window_params = [{pipeline_mode = #tpu.pipeline_mode<synchronous>, transform_indices = @transform_0, window_bounds = array<i64: 16, 32>}, {pipeline_mode = #tpu.pipeline_mode<synchronous>, transform_indices = @transform_1, window_bounds = array<i64: 16, 32>}, {pipeline_mode = #tpu.pipeline_mode<synchronous>, transform_indices = @transform_2, window_bounds = array<i64: 64, 64>}, {transform_indices = @transform_3, window_bounds = array<i64: 1, 32, 96>}, {transform_indices = @transform_4, window_bounds = array<i64: 1, 32, 32>}, {transform_indices = @transform_5, window_bounds = array<i64: 1, 32, 64>}, {transform_indices = @transform_6, window_bounds = array<i64: 1, 64, 32>}, {transform_indices = @transform_7, window_bounds = array<i64: 1, 8, 64>}, {pipeline_mode = #tpu.pipeline_mode<synchronous>, transform_indices = @transform_8, window_bounds = array<i64: 16, 32>}]} {
    %c0_i32 = arith.constant 0 : i32
    %0 = arith.cmpi eq, %arg0, %c0_i32 : i32
    %1 = arith.extui %0 : i1 to i32
    %c0_i32_0 = arith.constant 0 : i32
    %2 = arith.cmpi ne, %1, %c0_i32_0 : i32
    scf.if %2 {
      %c0_42 = arith.constant 0 : index
      %c0_43 = arith.constant 0 : index
      %126 = vector.load %arg1[%c0_42, %c0_43] : memref<16x32xf32, #tpu.memory_space<vmem>>, vector<16x32xf32>
      %cst_44 = arith.constant 5.65685415 : f32
      %127 = vector.broadcast %cst_44 : f32 to vector<16x32xf32>
      %128 = arith.mulf %126, %127 : vector<16x32xf32>
      %c0_45 = arith.constant 0 : index
      %c0_46 = arith.constant 0 : index
      %129 = vector.load %arg2[%c0_45, %c0_46] : memref<16x32xf32, #tpu.memory_space<vmem>>, vector<16x32xf32>
      %130 = arith.addf %128, %129 : vector<16x32xf32>
      %c0_47 = arith.constant 0 : index
      %c0_48 = arith.constant 0 : index
      %131 = vector.load %arg10[%c0_47, %c0_48] : memref<16x32xf32, #tpu.memory_space<vmem>>, vector<16x32xf32>
      tpu.vector_store %arg10[%c0_47, %c0_48], %130 {strides = array<i32>} : memref<16x32xf32, #tpu.memory_space<vmem>>, vector<16x32xf32>,
    } else {
    }
    %c0 = arith.constant 0 : index
    %c0_1 = arith.constant 0 : index
    %3 = vector.load %arg10[%c0, %c0_1] : memref<16x32xf32, #tpu.memory_space<vmem>>, vector<16x32xf32>
    %c0_2 = arith.constant 0 : index
    %c0_3 = arith.constant 0 : index
    %c0_4 = arith.constant 0 : index
    %4 = vector.load %arg8[%c0_2, %c0_3, %c0_4] : memref<1x8x64xf32, #tpu.memory_space<vmem>>, vector<1x8x64xf32>
    %5 = vector.shape_cast %4 : vector<1x8x64xf32> to vector<8x64xf32>
    %6 = vector.extract_strided_slice %5 {offsets = [0, 0], sizes = [1, 64], strides = [1, 1]} : vector<8x64xf32> to vector<1x64xf32>
    %7 = vector.extract_strided_slice %5 {offsets = [1, 0], sizes = [1, 32], strides = [1, 1]} : vector<8x64xf32> to vector<1x32xf32>
    %8 = vector.extract_strided_slice %5 {offsets = [2, 0], sizes = [1, 32], strides = [1, 1]} : vector<8x64xf32> to vector<1x32xf32>
    %9 = vector.extract_strided_slice %5 {offsets = [3, 0], sizes = [1, 32], strides = [1, 1]} : vector<8x64xf32> to vector<1x32xf32>
    %10 = vector.extract_strided_slice %5 {offsets = [4, 0], sizes = [1, 32], strides = [1, 1]} : vector<8x64xf32> to vector<1x32xf32>
    %11 = vector.extract_strided_slice %5 {offsets = [5, 0], sizes = [1, 32], strides = [1, 1]} : vector<8x64xf32> to vector<1x32xf32>
    %12 = vector.extract_strided_slice %5 {offsets = [6, 0], sizes = [1, 32], strides = [1, 1]} : vector<8x64xf32> to vector<1x32xf32>
    %13 = vector.extract_strided_slice %5 {offsets = [7, 0], sizes = [1, 32], strides = [1, 1]} : vector<8x64xf32> to vector<1x32xf32>
    %c0_5 = arith.constant 0 : index
    %c0_6 = arith.constant 0 : index
    %c0_7 = arith.constant 0 : index
    %14 = vector.load %arg4[%c0_5, %c0_6, %c0_7] : memref<1x32x96xf32, #tpu.memory_space<vmem>>, vector<1x32x96xf32>
    %15 = vector.shape_cast %14 : vector<1x32x96xf32> to vector<32x96xf32>
    %cst = arith.constant dense<0.000000e+00> : vector<16x96xf32>
    %16 = tpu.matmul %3, %15, %cst {dimension_numbers = #tpu.dot_dimension_numbers<[1], [0], [0], [1], [0, 0, 1, 1], [], []>} : vector<16x32xf32>, vector<32x96xf32>, vector<16x96xf32> -> vector<16x96xf32>
    %17 = vector.extract_strided_slice %16 {offsets = [0, 0], sizes = [16, 32], strides = [1, 1]} : vector<16x96xf32> to vector<16x32xf32>
    %18 = vector.broadcast %7 : vector<1x32xf32> to vector<16x32xf32>
    %19 = arith.addf %17, %18 : vector<16x32xf32>
    %20 = vector.extract_strided_slice %16 {offsets = [0, 32], sizes = [16, 32], strides = [1, 1]} : vector<16x96xf32> to vector<16x32xf32>
    %21 = vector.broadcast %8 : vector<1x32xf32> to vector<16x32xf32>
    %22 = arith.addf %20, %21 : vector<16x32xf32>
    %23 = vector.extract_strided_slice %16 {offsets = [0, 64], sizes = [16, 32], strides = [1, 1]} : vector<16x96xf32> to vector<16x32xf32>
    %24 = vector.broadcast %9 : vector<1x32xf32> to vector<16x32xf32>
    %25 = arith.addf %23, %24 : vector<16x32xf32>
    %26 = vector.extract_strided_slice %19 {offsets = [0, 0], sizes = [16, 8], strides = [1, 1]} : vector<16x32xf32> to vector<16x8xf32>
    %27 = vector.extract_strided_slice %19 {offsets = [0, 8], sizes = [16, 8], strides = [1, 1]} : vector<16x32xf32> to vector<16x8xf32>
    %28 = vector.extract_strided_slice %19 {offsets = [0, 16], sizes = [16, 8], strides = [1, 1]} : vector<16x32xf32> to vector<16x8xf32>
    %29 = vector.extract_strided_slice %19 {offsets = [0, 24], sizes = [16, 8], strides = [1, 1]} : vector<16x32xf32> to vector<16x8xf32>
    %30 = tpu.concatenate %26, %27, %28, %29 in 0 : vector<16x8xf32>, vector<16x8xf32>, vector<16x8xf32>, vector<16x8xf32> -> vector<64x8xf32>
    %31 = vector.extract_strided_slice %22 {offsets = [0, 0], sizes = [16, 8], strides = [1, 1]} : vector<16x32xf32> to vector<16x8xf32>
    %32 = vector.extract_strided_slice %22 {offsets = [0, 8], sizes = [16, 8], strides = [1, 1]} : vector<16x32xf32> to vector<16x8xf32>
    %33 = vector.extract_strided_slice %22 {offsets = [0, 16], sizes = [16, 8], strides = [1, 1]} : vector<16x32xf32> to vector<16x8xf32>
    %34 = vector.extract_strided_slice %22 {offsets = [0, 24], sizes = [16, 8], strides = [1, 1]} : vector<16x32xf32> to vector<16x8xf32>
    %35 = tpu.concatenate %31, %32, %33, %34 in 0 : vector<16x8xf32>, vector<16x8xf32>, vector<16x8xf32>, vector<16x8xf32> -> vector<64x8xf32>
    %36 = vector.extract_strided_slice %25 {offsets = [0, 0], sizes = [16, 8], strides = [1, 1]} : vector<16x32xf32> to vector<16x8xf32>
    %37 = vector.extract_strided_slice %25 {offsets = [0, 8], sizes = [16, 8], strides = [1, 1]} : vector<16x32xf32> to vector<16x8xf32>
    %38 = vector.extract_strided_slice %25 {offsets = [0, 16], sizes = [16, 8], strides = [1, 1]} : vector<16x32xf32> to vector<16x8xf32>
    %39 = vector.extract_strided_slice %25 {offsets = [0, 24], sizes = [16, 8], strides = [1, 1]} : vector<16x32xf32> to vector<16x8xf32>
    %40 = tpu.concatenate %36, %37, %38, %39 in 0 : vector<16x8xf32>, vector<16x8xf32>, vector<16x8xf32>, vector<16x8xf32> -> vector<64x8xf32>
    %cst_8 = arith.constant dense<0.000000e+00> : vector<64x64xf32>
    %41 = tpu.matmul %30, %35, %cst_8 {dimension_numbers = #tpu.dot_dimension_numbers<[1], [1], [0], [0], [0, 0, 1, 0], [], []>} : vector<64x8xf32>, vector<64x8xf32>, vector<64x64xf32> -> vector<64x64xf32>
    %cst_9 = arith.constant 0.353553385 : f32
    %42 = vector.broadcast %cst_9 : f32 to vector<64x64xf32>
    %43 = arith.mulf %41, %42 : vector<64x64xf32>
    %c0_10 = arith.constant 0 : index
    %c0_11 = arith.constant 0 : index
    %44 = vector.load %arg3[%c0_10, %c0_11] : memref<64x64xf32, #tpu.memory_space<vmem>>, vector<64x64xf32>
    %45 = arith.addf %43, %44 : vector<64x64xf32>
    %cst_12 = arith.constant dense<0xFF800000> : vector<64xf32>
    %46 = vector.multi_reduction <maximumf>, %45, %cst_12 [1] : vector<64x64xf32> to vector<64xf32>
    %47 = vector.shape_cast %46 : vector<64xf32> to vector<64x1xf32>
    %48 = vector.broadcast %47 : vector<64x1xf32> to vector<64x64xf32>
    %49 = arith.subf %45, %48 : vector<64x64xf32>
    %50 = math.exp %49 : vector<64x64xf32>
    %cst_13 = arith.constant dense<0.000000e+00> : vector<64xf32>
    %51 = vector.multi_reduction <add>, %50, %cst_13 [1] : vector<64x64xf32> to vector<64xf32>
    %52 = vector.shape_cast %51 : vector<64xf32> to vector<64x1xf32>
    %53 = vector.broadcast %52 : vector<64x1xf32> to vector<64x64xf32>
    %54 = arith.divf %50, %53 : vector<64x64xf32>
    %cst_14 = arith.constant dense<0.000000e+00> : vector<64x8xf32>
    %55 = tpu.matmul %54, %40, %cst_14 {dimension_numbers = #tpu.dot_dimension_numbers<[1], [0], [0], [1], [0, 0, 1, 1], [], []>} : vector<64x64xf32>, vector<64x8xf32>, vector<64x8xf32> -> vector<64x8xf32>
    %56 = vector.extract_strided_slice %55 {offsets = [0, 0], sizes = [16, 8], strides = [1, 1]} : vector<64x8xf32> to vector<16x8xf32>
    %57 = vector.extract_strided_slice %55 {offsets = [16, 0], sizes = [16, 8], strides = [1, 1]} : vector<64x8xf32> to vector<16x8xf32>
    %58 = vector.extract_strided_slice %55 {offsets = [32, 0], sizes = [16, 8], strides = [1, 1]} : vector<64x8xf32> to vector<16x8xf32>
    %59 = vector.extract_strided_slice %55 {offsets = [48, 0], sizes = [16, 8], strides = [1, 1]} : vector<64x8xf32> to vector<16x8xf32>
    %60 = tpu.concatenate %56, %57, %58, %59 in 1 : vector<16x8xf32>, vector<16x8xf32>, vector<16x8xf32>, vector<16x8xf32> -> vector<16x32xf32>
    %c0_15 = arith.constant 0 : index
    %c0_16 = arith.constant 0 : index
    %c0_17 = arith.constant 0 : index
    %61 = vector.load %arg5[%c0_15, %c0_16, %c0_17] : memref<1x32x32xf32, #tpu.memory_space<vmem>>, vector<1x32x32xf32>
    %62 = vector.shape_cast %61 : vector<1x32x32xf32> to vector<32x32xf32>
    %cst_18 = arith.constant dense<0.000000e+00> : vector<16x32xf32>
    %63 = tpu.matmul %60, %62, %cst_18 {dimension_numbers = #tpu.dot_dimension_numbers<[1], [0], [0], [1], [0, 0, 1, 1], [], []>} : vector<16x32xf32>, vector<32x32xf32>, vector<16x32xf32> -> vector<16x32xf32>
    %64 = vector.broadcast %10 : vector<1x32xf32> to vector<16x32xf32>
    %65 = arith.addf %63, %64 : vector<16x32xf32>
    %66 = arith.addf %3, %65 : vector<16x32xf32>
    %cst_19 = arith.constant dense<0.000000e+00> : vector<16xf32>
    %67 = vector.multi_reduction <add>, %66, %cst_19 [1] : vector<16x32xf32> to vector<16xf32>
    %68 = vector.shape_cast %67 : vector<16xf32> to vector<16x1xf32>
    %cst_20 = arith.constant 3.200000e+01 : f32
    %69 = vector.broadcast %cst_20 : f32 to vector<16x1xf32>
    %70 = arith.divf %68, %69 : vector<16x1xf32>
    %71 = vector.broadcast %70 : vector<16x1xf32> to vector<16x32xf32>
    %72 = arith.subf %66, %71 : vector<16x32xf32>
    %73 = arith.mulf %72, %72 : vector<16x32xf32>
    %cst_21 = arith.constant dense<0.000000e+00> : vector<16xf32>
    %74 = vector.multi_reduction <add>, %73, %cst_21 [1] : vector<16x32xf32> to vector<16xf32>
    %75 = vector.shape_cast %74 : vector<16xf32> to vector<16x1xf32>
    %cst_22 = arith.constant 3.200000e+01 : f32
    %76 = vector.broadcast %cst_22 : f32 to vector<16x1xf32>
    %77 = arith.divf %75, %76 : vector<16x1xf32>
    %78 = vector.broadcast %70 : vector<16x1xf32> to vector<16x32xf32>
    %79 = arith.subf %66, %78 : vector<16x32xf32>
    %cst_23 = arith.constant 9.99999974E-6 : f32
    %80 = vector.broadcast %cst_23 : f32 to vector<16x1xf32>
    %81 = arith.addf %77, %80 : vector<16x1xf32>
    %82 = math.rsqrt %81 : vector<16x1xf32>
    %83 = vector.broadcast %82 : vector<16x1xf32> to vector<16x32xf32>
    %84 = arith.mulf %79, %83 : vector<16x32xf32>
    %85 = vector.broadcast %11 : vector<1x32xf32> to vector<16x32xf32>
    %86 = arith.mulf %84, %85 : vector<16x32xf32>
    %87 = vector.broadcast %12 : vector<1x32xf32> to vector<16x32xf32>
    %88 = arith.addf %86, %87 : vector<16x32xf32>
    %c0_24 = arith.constant 0 : index
    %c0_25 = arith.constant 0 : index
    %c0_26 = arith.constant 0 : index
    %89 = vector.load %arg6[%c0_24, %c0_25, %c0_26] : memref<1x32x64xf32, #tpu.memory_space<vmem>>, vector<1x32x64xf32>
    %90 = vector.shape_cast %89 : vector<1x32x64xf32> to vector<32x64xf32>
    %cst_27 = arith.constant dense<0.000000e+00> : vector<16x64xf32>
    %91 = tpu.matmul %88, %90, %cst_27 {dimension_numbers = #tpu.dot_dimension_numbers<[1], [0], [0], [1], [0, 0, 1, 1], [], []>} : vector<16x32xf32>, vector<32x64xf32>, vector<16x64xf32> -> vector<16x64xf32>
    %92 = vector.broadcast %6 : vector<1x64xf32> to vector<16x64xf32>
    %93 = arith.addf %91, %92 : vector<16x64xf32>
    %cst_28 = arith.constant 0.000000e+00 : f32
    %94 = vector.broadcast %cst_28 : f32 to vector<16x64xf32>
    %95 = arith.maximumf %93, %94 : vector<16x64xf32>
    %c0_29 = arith.constant 0 : index
    %c0_30 = arith.constant 0 : index
    %c0_31 = arith.constant 0 : index
    %96 = vector.load %arg7[%c0_29, %c0_30, %c0_31] : memref<1x64x32xf32, #tpu.memory_space<vmem>>, vector<1x64x32xf32>
    %97 = vector.shape_cast %96 : vector<1x64x32xf32> to vector<64x32xf32>
    %cst_32 = arith.constant dense<0.000000e+00> : vector<16x32xf32>
    %98 = tpu.matmul %95, %97, %cst_32 {dimension_numbers = #tpu.dot_dimension_numbers<[1], [0], [0], [1], [0, 0, 1, 1], [], []>} : vector<16x64xf32>, vector<64x32xf32>, vector<16x32xf32> -> vector<16x32xf32>
    %99 = vector.broadcast %13 : vector<1x32xf32> to vector<16x32xf32>
    %100 = arith.addf %98, %99 : vector<16x32xf32>
    %101 = arith.addf %88, %100 : vector<16x32xf32>
    %cst_33 = arith.constant dense<0.000000e+00> : vector<16xf32>
    %102 = vector.multi_reduction <add>, %101, %cst_33 [1] : vector<16x32xf32> to vector<16xf32>
    %103 = vector.shape_cast %102 : vector<16xf32> to vector<16x1xf32>
    %cst_34 = arith.constant 3.200000e+01 : f32
    %104 = vector.broadcast %cst_34 : f32 to vector<16x1xf32>
    %105 = arith.divf %103, %104 : vector<16x1xf32>
    %106 = vector.broadcast %105 : vector<16x1xf32> to vector<16x32xf32>
    %107 = arith.subf %101, %106 : vector<16x32xf32>
    %108 = arith.mulf %107, %107 : vector<16x32xf32>
    %cst_35 = arith.constant dense<0.000000e+00> : vector<16xf32>
    %109 = vector.multi_reduction <add>, %108, %cst_35 [1] : vector<16x32xf32> to vector<16xf32>
    %110 = vector.shape_cast %109 : vector<16xf32> to vector<16x1xf32>
    %cst_36 = arith.constant 3.200000e+01 : f32
    %111 = vector.broadcast %cst_36 : f32 to vector<16x1xf32>
    %112 = arith.divf %110, %111 : vector<16x1xf32>
    %113 = vector.broadcast %105 : vector<16x1xf32> to vector<16x32xf32>
    %114 = arith.subf %101, %113 : vector<16x32xf32>
    %cst_37 = arith.constant 9.99999974E-6 : f32
    %115 = vector.broadcast %cst_37 : f32 to vector<16x1xf32>
    %116 = arith.addf %112, %115 : vector<16x1xf32>
    %117 = math.rsqrt %116 : vector<16x1xf32>
    %118 = vector.broadcast %117 : vector<16x1xf32> to vector<16x32xf32>
    %119 = arith.mulf %114, %118 : vector<16x32xf32>
    %120 = vector.broadcast %11 : vector<1x32xf32> to vector<16x32xf32>
    %121 = arith.mulf %119, %120 : vector<16x32xf32>
    %122 = vector.broadcast %12 : vector<1x32xf32> to vector<16x32xf32>
    %123 = arith.addf %121, %122 : vector<16x32xf32>
    %c0_38 = arith.constant 0 : index
    %c0_39 = arith.constant 0 : index
    %124 = vector.load %arg10[%c0_38, %c0_39] : memref<16x32xf32, #tpu.memory_space<vmem>>, vector<16x32xf32>
    tpu.vector_store %arg10[%c0_38, %c0_39], %123 {strides = array<i32>} : memref<16x32xf32, #tpu.memory_space<vmem>>, vector<16x32xf32>,
    %c0_40 = arith.constant 0 : index
    %c0_41 = arith.constant 0 : index
    %125 = vector.load %arg9[%c0_40, %c0_41] : memref<16x32xf32, #tpu.memory_space<vmem>>, vector<16x32xf32>
    tpu.vector_store %arg9[%c0_40, %c0_41], %123 {strides = array<i32>} : memref<16x32xf32, #tpu.memory_space<vmem>>, vector<16x32xf32>,
    return
  }
  func.func @transform_0(%arg0: i32) -> (i32, i32) {
    %c0_i32 = arith.constant 0 : i32
    %c0_i32_0 = arith.constant 0 : i32
    %c0_i32_1 = arith.constant 0 : i32
    return %c0_i32, %c0_i32_0 : i32, i32
  }
  func.func @transform_1(%arg0: i32) -> (i32, i32) {
    %c0_i32 = arith.constant 0 : i32
    %c0_i32_0 = arith.constant 0 : i32
    %c0_i32_1 = arith.constant 0 : i32
    return %c0_i32, %c0_i32_0 : i32, i32
  }
  func.func @transform_2(%arg0: i32) -> (i32, i32) {
    %c0_i32 = arith.constant 0 : i32
    %c0_i32_0 = arith.constant 0 : i32
    %c0_i32_1 = arith.constant 0 : i32
    return %c0_i32, %c0_i32_0 : i32, i32
  }
  func.func @transform_3(%arg0: i32) -> (i32, i32, i32) {
    %c0_i32 = arith.constant 0 : i32
    %c0_i32_0 = arith.constant 0 : i32
    %c0_i32_1 = arith.constant 0 : i32
    return %arg0, %c0_i32, %c0_i32_0 : i32, i32, i32
  }
  func.func @transform_4(%arg0: i32) -> (i32, i32, i32) {
    %c0_i32 = arith.constant 0 : i32
    %c0_i32_0 = arith.constant 0 : i32
    %c0_i32_1 = arith.constant 0 : i32
    return %arg0, %c0_i32, %c0_i32_0 : i32, i32, i32
  }
  func.func @transform_5(%arg0: i32) -> (i32, i32, i32) {
    %c0_i32 = arith.constant 0 : i32
    %c0_i32_0 = arith.constant 0 : i32
    %c0_i32_1 = arith.constant 0 : i32
    return %arg0, %c0_i32, %c0_i32_0 : i32, i32, i32
  }
  func.func @transform_6(%arg0: i32) -> (i32, i32, i32) {
    %c0_i32 = arith.constant 0 : i32
    %c0_i32_0 = arith.constant 0 : i32
    %c0_i32_1 = arith.constant 0 : i32
    return %arg0, %c0_i32, %c0_i32_0 : i32, i32, i32
  }
  func.func @transform_7(%arg0: i32) -> (i32, i32, i32) {
    %c0_i32 = arith.constant 0 : i32
    %c0_i32_0 = arith.constant 0 : i32
    %c0_i32_1 = arith.constant 0 : i32
    return %arg0, %c0_i32, %c0_i32_0 : i32, i32, i32
  }
  func.func @transform_8(%arg0: i32) -> (i32, i32) {
    %c0_i32 = arith.constant 0 : i32
    %c0_i32_0 = arith.constant 0 : i32
    %c0_i32_1 = arith.constant 0 : i32
    return %c0_i32, %c0_i32_0 : i32, i32
  }
}

</mosaic_0001>

<bundles_post_ra>
// kernel: tpu_custom_call.1
= control target key start
LH: loop header
LB: loop body
LE: loop exit
PB: predicated region body
PF: predicated region fallthrough
CT: control target
= control target key end

     0   :  { %s2676_s0 = inlined_call_operand.hbm [shape: f32[16,32], index: 0, kind: input, shape index: {}]   ;;  %s2677_s1 = inlined_call_operand.hbm [shape: f32[16,32], index: 1, kind: input, shape index: {}]   ;;  %s2678_s2 = inlined_call_operand.vmem [shape: f32[64,64], index: 2, kind: input, shape index: {}]   ;;  %s2679_s3 = inlined_call_operand.vmem [shape: f32[2,32,96], index: 3, kind: input, shape index: {}]   ;;  %s2680_s4 = inlined_call_operand.vmem [shape: f32[2,32,32], index: 4, kind: input, shape index: {}]   ;;  %s2681_s5 = inlined_call_operand.hbm [shape: f32[2,32,64], index: 5, kind: input, shape index: {}]   ;;  %s2682_s6 = inlined_call_operand.vmem [shape: f32[2,64,32], index: 6, kind: input, shape index: {}]   ;;  %s2683_s7 = inlined_call_operand.vmem [shape: f32[2,8,64], index: 7, kind: input, shape index: {}]   ;;  %s2684_s8 = inlined_call_operand.hbm [shape: f32[16,32], index: 8, kind: output, shape index: {}]  }
   0x1   :  { %2692 = sst [smem:[#allocation16_spill]] %s2684_s8 }
   0x2   :  { %13 = vsyncpa [#allocation4], 0 }
   0x3   :  { %14 = vsyncpa [#allocation7], 0 }
   0x4   :  { %15 = vsyncpa [#allocation5], 0  ;;  %s2234_s27 = smov 0   ;;  %s2236_s28 = smov 0  }
   0x5   :  { %s2238_s29 = smov 0   ;;  %s2240_s30 = smov 0  }
   0x6 LB: > { %s2253_s9 = sadd.s32 4294967295, %s2171_s30   ;;  %s2256_s10 = sadd.s32 1, %s2171_s30   ;;  %s2171_s30 = sphi %s2240_s30, %s2711_s30   ;;  %s2167_s29 = sphi %s2238_s29, %s2715_s29   ;;  %s2163_s28 = sphi %s2236_s28, %s2714_s28   ;;  %s2159_s27 = sphi %s2234_s27, %s2713_s27  }
   0x7   : > { %2693 = sst [smem:[#allocation14_spill]] %s2256_s10  ;;  %s140_s11 = ssub.s32 %s2171_s30, %s2256_s10 }
   0x8   : > { %s143_s12 = sadd.s32 1, %s2167_s29  ;;  %p141_p0 = scmp.eq.s32.totalorder %s140_s11, 0 }
   0x9   : > { %p150_p1 = scmp.ne.s32.totalorder %s2167_s29, %s2163_s28  ;;  %p151_p2 = scmp.eq.s32.totalorder %s2171_s30, 0 }
   0xa   : > { %p156_p3 = scmp.ne.s32.totalorder %s2163_s28, %s2159_s27  ;;  %p2685_p5 = scmp.eq.s32.totalorder %s2253_s9, 0 }
   0xb   : > { %s2266_s13 = scalar_select %p141_p0, %s2167_s29, %s143_s12  }
   0xc   : > { %p2268_p4 = por %p151_p2, %p150_p1  ;;  %p1517_p6 = scmp.ge.s32.totalorder %s2171_s30, 1 }
   0xd   : > { %2694 = sst [smem:[#allocation15_spill]] %s2266_s13  ;;  %p240_p7 = scmp.lt.s32.totalorder %s2171_s30, 3 }
   0xe   : > { %p2277_p8 = por %p2685_p5, %p156_p3  ;;  %s2173_s17 = smov [#allocation3]  }
   0xf   : > { %p2282_p10 = pnand %p1517_p6, %p240_p7  ;;  %s252_s18 = sshll.u32 %s2173_s17, 4  ;;  %s253_s18 = int_to_ptr.vmem [resolvable:$true] %s252_s18 }
  0x10   : > { %s2696_s15 = scalar_select %p2277_p8, 1, 0 }
  0x11   : > { %s2697_s16 = scalar_select %p2282_p10, 1, 0 }
  0x12   : > { %p1838_p11 = pneg %p2282_p10  ;;  %p1851_p13 = scmp.lt.s32.totalorder %s2171_s30, 2 }
  0x13   : > { %s2013_s23 = scalar_lea.hbm %s2676_s0, 256 }
  0x14   : > { %p2290_p12 = pnand %p1838_p11, %p2685_p5  ;;  %p2297_p0 = pnand %p1851_p13, %p2268_p4 }
  0x15   : > { %p2014_p1 = scmp.ne.s32.totalorder %s2676_s0, %s2013_s23  ;;  %p2020_p4 = scmp.lt.u32.totalorder %s2013_s23, %s2676_s0 }
  0x16   : > { %s2699_s20 = scalar_select %p2297_p0, 1, 0 }
  0x17   : > { %p2015_p2 = pneg %p2290_p12 }
  0x19   : > { %p2016_p3 = pnand %p2015_p2, %p2014_p1 }
  0x1b   : > { %p2017_p6 = pneg %p2016_p3 }
  0x1d   : > { %p2022_p7 = pnand %p2020_p4, %p2017_p6 }
  0x1f   : > { %2025 = shalt.err (!%p2022_p7)
}
  0x20   : > { %s2026_s11 = scalar_lea.vmem %s253_s18, 256  ;;  %p2034_p5 = scmp.lt.s32.totalorder %s253_s18, %s253_s18 }
  0x21   : > { %p2027_p11 = scmp.ne.s32.totalorder %s253_s18, %s2026_s11  ;;  %p2035_p8 = scmp.lt.s32.totalorder %s2026_s11, %s2026_s11 }
  0x23   : > { %p2029_p13 = pnand %p2027_p11, %p2015_p2  ;;  %p2036_p10 = por %p2035_p8, %p2034_p5 }
  0x25   : > { %p2030_p9 = pneg %p2029_p13 }
  0x27   : > { %p2037_p0 = pnand %p2036_p10, %p2030_p9 }
  0x29   : > { %2040 = shalt.err (!%p2037_p0)
}
  0x2a   : > { %s2174_s12 = smov 128   ;;  %s2175_s14 = smov 8  }
  0x2b   : > { %1841 = dma.hbm_to_vmem [thread:$0]  (!%p2290_p12), %s2676_s0, 256, %s253_s18, [#allocation4], %s2174_s12, %s2174_s12, %s2175_s14  }
  0x2c   : > { %s2176_s22 = smov [#allocation6]   ;;  %s298_s24 = sand.u32 1, %s2171_s30  }
  0x2d   : > { %s265_s23 = sshll.u32 %s2176_s22, 4  ;;  %s2041_s27 = scalar_lea.hbm %s2677_s1, 256  ;;  %s266_s23 = int_to_ptr.vmem [resolvable:$true] %s265_s23 }
  0x2e   : > { %p2042_p5 = scmp.ne.s32.totalorder %s2677_s1, %s2041_s27  ;;  %p2048_p10 = scmp.lt.u32.totalorder %s2041_s27, %s2677_s1 }
  0x30   : > { %p2044_p8 = pnand %p2042_p5, %p2015_p2 }
  0x32   : > { %p2045_p9 = pneg %p2044_p8 }
  0x34   : > { %p2050_p0 = pnand %p2048_p10, %p2045_p9 }
  0x36   : > { %2053 = shalt.err (!%p2050_p0)
}
  0x37   : > { %s2054_s18 = scalar_lea.vmem %s266_s23, 256  ;;  %p2062_p4 = scmp.lt.s32.totalorder %s266_s23, %s266_s23 }
  0x38   : > { %p2055_p1 = scmp.ne.s32.totalorder %s266_s23, %s2054_s18  ;;  %p2063_p7 = scmp.lt.s32.totalorder %s2054_s18, %s2054_s18 }
  0x3a   : > { %p2057_p3 = pnand %p2055_p1, %p2015_p2  ;;  %p2064_p11 = por %p2063_p7, %p2062_p4 }
  0x3c   : > { %p2058_p6 = pneg %p2057_p3 }
  0x3e   : > { %p2065_p13 = pnand %p2064_p11, %p2058_p6 }
  0x40   : > { %2068 = shalt.err (!%p2065_p13)
}
  0x41   : > { %1844 = dma.hbm_to_vmem [thread:$0]  (!%p2290_p12), %s2677_s1, 256, %s266_s23, [#allocation7], %s2174_s12, %s2174_s12, %s2175_s14  }
  0x42   : > { %s300_s13 = sand.u32 1, %s2167_s29   ;;  %s1572_s17 = sshll.u32 %s2171_s30, 9 }
  0x43   : > { %s1521_s21 = sshll.u32 %s300_s13, 5  ;;  %s2355_s26 = scalar_lea.hbm %s2681_s5, %s1572_s17 }
  0x44   : > { %s302_s19 = scalar_lea.vmem [#allocation8], %s1521_s21  ;;  %s2359_s11 = scalar_lea.sflag [#allocation4], %s298_s24 }
  0x45   : > { %s309_s27 = sshll.u32 %s302_s19, 4  ;;  %s2069_s18 = scalar_lea.hbm %s2355_s26, 512  ;;  %s2357_s27 = int_to_ptr.vmem [resolvable:$true] %s309_s27 }
  0x46   : > { %p2070_p12 = scmp.ne.s32.totalorder %s2355_s26, %s2069_s18  ;;  %p2700_p2 = scmp.ne.s32.totalorder %s2699_s20, 0 }
  0x47   : > { %s2074_s8 = scalar_lea.hbm %s2681_s5, 1024  ;;  %p2075_p10 = scmp.lt.u32.totalorder %s2355_s26, %s2681_s5 }
  0x48   : > { %p2071_p5 = pneg %p2700_p2  ;;  %p2076_p0 = scmp.lt.u32.totalorder %s2074_s8, %s2069_s18 }
  0x49   : > { %p2078_p3 = scmp.lt.u32.totalorder %s2069_s18, %s2355_s26 }
  0x4a   : > { %p2072_p8 = pnand %p2071_p5, %p2070_p12  ;;  %p2077_p1 = por %p2076_p0, %p2075_p10 }
  0x4c   : > { %p2073_p9 = pneg %p2072_p8  ;;  %p2079_p6 = por %p2078_p3, %p2077_p1 }
  0x4e   : > { %p2080_p4 = pnand %p2079_p6, %p2073_p9 }
  0x50   : > { %2083 = shalt.err (!%p2080_p4)
}
  0x51   : > { %s2084_s24 = scalar_lea.vmem %s2357_s27, 512  ;;  %s2177_s17 = smov [#allocation8]  }
  0x52   : > { %p2085_p7 = scmp.ne.s32.totalorder %s2357_s27, %s2084_s24  ;;  %s2089_s21 = sshll.u32 %s2177_s17, 4  ;;  %s2090_s21 = int_to_ptr.vmem [resolvable:$false] %s2089_s21 }
  0x53   : > { %s2091_s22 = scalar_lea.vmem %s2090_s21, 1024  ;;  %p2092_p12 = scmp.lt.s32.totalorder %s2357_s27, %s2090_s21 }
  0x54   : > { %p2087_p11 = pnand %p2085_p7, %p2071_p5  ;;  %p2093_p8 = scmp.lt.s32.totalorder %s2091_s22, %s2084_s24 }
  0x56   : > { %p2088_p13 = pneg %p2087_p11  ;;  %p2094_p10 = por %p2093_p8, %p2092_p12 }
  0x58   : > { %p2095_p0 = pnand %p2094_p10, %p2088_p13 }
  0x5a   : > { %2098 = shalt.err (!%p2095_p0)
}
  0x5b   : > { %1848 = dma.hbm_to_vmem [thread:$0]  (!%p2700_p2), %s2355_s26, 512, %s2357_s27, %s2359_s11, %s2174_s12, %s2174_s12, %s2175_s14  }
  0x5c   : > { %p2701_p5 = scmp.ne.s32.totalorder %s2697_s16, 0 }
  0x5d   : > { %p2702_p9 = scmp.eq.s32.totalorder (!%p2701_p5), %s2253_s9, 0 }
  0x5e   : > { %336 = sbr.rel (%p2701_p5) target bundleno = 2813 (0xafd), region = 52 }
  0x65   : > { %2142 = dma.done.wait (%p2702_p9), [#allocation4], 256   ;;  %p2703_p1 = pmov %p2702_p9 }
  0x67   : > { %2144 = vsyncadd (%p2703_p1), [#allocation4], 4294967040  ;;  %p2704_p3 = pmov %p2703_p1 }
  0x68   : > { %p2705_p6 = pmov %p2703_p1 }
  0x69   : > { %2146 = dma.done.wait (%p2704_p3), [#allocation7], 256  }
  0x6a   : > { %2148 = vsyncadd (%p2705_p6), [#allocation7], 4294967040  ;;  %s346_s20 = sand.u32 1, %s2253_s9   ;;  %s348_s12 = sand.u32 1, %s2163_s28  }
  0x6b   : > { %s1527_s14 = sshll.u32 %s348_s12, 5  ;;  %s347_s16 = scalar_lea.sflag [#allocation4], %s346_s20 }
  0x6c   : > { %s2402_s25 = scalar_lea.vmem [#allocation8], %s1527_s14  ;;  %p2706_p2 = scmp.ne.s32.totalorder %s2696_s15, 0 }
  0x6e   : > { %2150 = dma.done.wait (%p2706_p2), %s347_s16, 512  }
  0x6f   : > { %2152 = vsyncadd (%p2706_p2), %s347_s16, 4294966784  ;;  %p397_p4 = scmp.lt.s32.totalorder %s2253_s9, 1  ;;  %p2707_p7 = scmp.ne.s32.totalorder %s2253_s9, 0 }
  0x70   : > { %v420_v0 = vld [vmem:[#allocation3] sm:$0xff] (!%p2707_p7)  ;;  %v424_v1 = vld [vmem:[#allocation6] sm:$0xff] (!%p2707_p7)  ;;  %v421_v2 = vld [vmem:[#allocation3 + $0x8] sm:$0xff] (!%p2707_p7)  ;;  %vm428_vm0 = vcmask (!%p2707_p7), 261120  }
  0x71   : > { %s398_s26 = scalar_select %p397_p4, %s2253_s9, 1 }
  0x72   : > { %419 = sbr.rel (%p2707_p7) target bundleno = 121 (0x79), region = 68  ;;  %v422_v3 = vmul.f32 (!%p2707_p7), 5.656854, %v420_v0  ;;  %v423_v4 = vmul.f32 (!%p2707_p7), 5.656854, %v421_v2  ;;  %v425_v5 = vld [vmem:[#allocation6 + $0x8] sm:$0xff] (!%p2707_p7) }
  0x73   : > { %s1573_s19 = sshll.u32 %s398_s26, 5  ;;  %s1575_s27 = sshll.u32 %s398_s26, 6 }
  0x74   : > { %s401_s30 = scalar_lea.vmem %s2679_s3, %s1573_s19  ;;  %s2416_s10 = scalar_lea.vmem %s2680_s4, %s1573_s19  ;;  %v426_v6 = vadd.f32 (!%p2707_p7), %v424_v1, %v422_v3  ;;  %v427_v7 = vadd.f32 (!%p2707_p7), %v425_v5, %v423_v4 }
  0x75   : > { %s2421_s15 = scalar_lea.vmem %s2682_s6, %s1575_s27  ;;  %s1534_s17 = sshll.u32 %s398_s26, 3 }
  0x76   : > { %s415_s20 = scalar_lea.vmem %s2683_s7, %s1534_s17  ;;  %429 = vst.msk [vmem:[#allocation2] sm:$0xff] (!%p2707_p7), %vm428_vm0, %v426_v6  ;;  %430 = vst.msk [vmem:[#allocation2 + $0x8] sm:$0xff] (!%p2707_p7), %vm428_vm0, %v427_v7 }
  0x79 PF: > { %v434_v8 = vld [vmem:[%s401_s30] sm:$0xff]  ;;  %v435_v9 = vld [vmem:[%s401_s30 + $0x8] sm:$0xff]  ;;  %v436_v10 = vld [vmem:[%s401_s30 + $0x10] sm:$0xff]  ;;  %vm438_vm1 = vcmask 261120   ;;  %v520_v11 = vlaneseq  ;;  %s2178_s12 = smov 32   ;;  %vm604_vm2 = vcmask 64512  }
  0x7a   : > { %v1744_v12 = vpack.c.bf16 %v435_v9, %v434_v8  ;;  %v437_v13 = vld [vmem:[%s401_s30 + $0x18] sm:$0xff]  ;;  %v2434_v17 = vld [vmem:[%s415_s20] sm:$0xff]  ;;  %s2179_s14 = smov 112   ;;  %s2180_s16 = smov 120   ;;  %vm2452_vm3 = vmpackc.low %vm604_vm2, %vm604_vm2  ;;  %vm766_vm4 = vcmask 523264   ;;  %vm1034_vm5 = vcmask 130048  }
  0x7b   : > { %v1748_v15 = vpack.c.bf16 %v437_v13, %v436_v10  ;;  %v2432_v16 = vshrl.u32 %v520_v11, 7  ;;  %s2181_s26 = smov 104   ;;  %s2182_s19 = smov 96   ;;  %v751_v0 = vld [vmem:[%s2678_s2 + $0x8] sm:$0xff]  ;;  %v750_v3 = vld [vmem:[%s2678_s2] sm:$0xff]  ;;  %v753_v8 = vld [vmem:[%s2678_s2 + $0x18] sm:$0xff] }
  0x7c   : > { %1745 = vmatprep.subr.bf16.mxu0 %v1744_v12  ;;  %s2183_s27 = smov 64   ;;  %vm1037_vm6 = vcmask 195584   ;;  %p1854_p11 = scmp.eq.s32.totalorder %s2253_s9, 1 }
  0x7d   : > { %v2428_v14 = vld [vmem:[#allocation2] sm:$0xff]  ;;  %1747 = vmatpush3.bf16.msra.mxu0 %v1744_v12  ;;  %v528_v18 = vsub.s32 2, %v2432_v16  ;;  %v2438_v20 = vld [vmem:[#allocation2 + $0x8] sm:$0xff]  ;;  %v522_v21 = vsub.s32 1, %v2432_v16  ;;  %v538_v39 = vsub.s32 3, %v2432_v16  ;;  %v752_v12 = vld [vmem:[%s2678_s2 + $0x10] sm:$0xff] }
  0x7e   : > { %1644 = vmatprep.mubr.msk.f32.mxu0 %vm438_vm1, %v2428_v14  ;;  %1749 = vmatprep.subr.bf16.mxu0 %v1748_v15 }
  0x7f   : > { %v529_v19 = vrot.slane %v2434_v17, %v528_v18  ;;  %v523_v22 = vrot.slane %v2434_v17, %v522_v21  ;;  %v539_v40 = vrot.slane %v2434_v17, %v538_v39 }
  0x81   : > { %1751 = vmatpush3.bf16.msra.mxu0 %v1748_v15  ;;  %531 = vrot.lane.b32.xlu0 %v529_v19, %s2178_s12 }
  0x84   : > { %1645 = vmatmul.mubr.msk.f32.vlgmr.msra.gmra.mrb[0].mxu0 %vm438_vm1, %v2438_v20 }
  0xf3   : > { %v532_v23 = vpop.permute.xlu0 %531 }
 0x157   : > { %v1646_v24 = vpop.f32.mrb[0].mxu0 }
 0x158   : > { %v2444_v25 = vadd.f32 %v1646_v24, %v523_v22  ;;  %v535_v26 = vadd.f32 %v1646_v24, %v532_v23  ;;  %v511_v27 = vpop.f32.mrb[1].mxu0 }
 0x159   : > { %v524_v28 = vadd.f32 %v523_v22, %v511_v27  ;;  %v534_v29 = vadd.f32 %v532_v23, %v511_v27  ;;  %v755_v22 = vld [vmem:[%s2678_s2 + $0x28] sm:$0xff] }
 0x15b   : > { %1663 = vmatprep.mubr.msk.f32.mxu1 %vm604_vm2, %v524_v28  ;;  %v1908_v30 = vpack.i.bf16 %v535_v26, %v534_v29  ;;  %v754_v26 = vld [vmem:[%s2678_s2 + $0x20] sm:$0xff] }
 0x15d   : > { %1909 = vrot.lane.b32.xlu1 %v1908_v30, %s2179_s14  ;;  %1904 = vrot.lane.b32.xlu0 %v1908_v30, %s2180_s16 }
 0x161   : > { %1914 = vrot.lane.b32.xlu1 %v1908_v30, %s2181_s26  ;;  %1919 = vrot.lane.b32.xlu0 %v1908_v30, %s2182_s19 }
 0x1cf   : > { %v1910_v31 = vpop.permute.xlu1 %1909  ;;  %v1905_v32 = vpop.permute.xlu0 %1904 }
 0x1d0   : > { %1929 = vrot.lane.b32.xlu0 %v1910_v31, %s2182_s19  ;;  %1924 = vrot.lane.b32.xlu1 %v1905_v32, %s2182_s19  ;;  %v757_v32 = vld [vmem:[%s2678_s2 + $0x38] sm:$0xff] }
 0x1d3   : > { %v1915_v33 = vpop.permute.xlu1 %1914  ;;  %v1920_v34 = vpop.permute.xlu0 %1919 }
 0x1d4   : > { %v1922_v35 = vunpack.i.h.bf16 %v1920_v34  ;;  %v1921_v36 = vunpack.i.l.bf16 %v1920_v34  ;;  %1934 = vrot.lane.b32.xlu1 %v1915_v33, %s2182_s19  ;;  %548 = vrot.lane.b32.xlu0 %v524_v28, %s2180_s16 }
 0x1d6   : > { %v1752_v38 = vpack.c.bf16 %v1922_v35, %v1921_v36  ;;  %v756_v36 = vld [vmem:[%s2678_s2 + $0x30] sm:$0xff] }
 0x1d8   : > { %1754 = vmatprep.subr.msk.bf16.mxu1 %vm2452_vm3, %v1752_v38  ;;  %550 = vrot.lane.b32.xlu1 %v2444_v25, %s2180_s16 }
 0x1d9   : > { %1757 = vmatpush3.bf16.xpose.msk.msra.mxu1 %vm2452_vm3, %v1752_v38  ;;  %552 = vrot.lane.b32.xlu0 %v524_v28, %s2179_s14 }
 0x1dc   : > { %554 = vrot.lane.b32.xlu1 %v2444_v25, %s2179_s14 }
 0x1dd   : > { %556 = vrot.lane.b32.xlu0 %v524_v28, %s2181_s26 }
 0x1e0   : > { %558 = vrot.lane.b32.xlu1 %v2444_v25, %s2181_s26 }
 0x1e1   : > { %541 = vrot.lane.b32.xlu0 %v539_v40, %s2183_s27 }
 0x242   : > { %v1930_v41 = vpop.permute.xlu0 %1929  ;;  %v1925_v42 = vpop.permute.xlu1 %1924 }
 0x243   : > { %v1932_v43 = vunpack.i.h.bf16 %v1930_v41  ;;  %v1931_v44 = vunpack.i.l.bf16 %v1930_v41  ;;  %v1927_v45 = vunpack.i.h.bf16 %v1925_v42  ;;  %v1926_v46 = vunpack.i.l.bf16 %v1925_v42 }
 0x245   : > { %v1758_v47 = vpack.c.bf16 %v1927_v45, %v1926_v46  ;;  %v1764_v48 = vpack.c.bf16 %v1932_v43, %v1931_v44 }
 0x246   : > { %v549_v49 = vpop.permute.xlu0 %548  ;;  %v1935_v50 = vpop.permute.xlu1 %1934 }
 0x247   : > { %1760 = vmatprep.subr.msk.bf16.mxu1 %vm2452_vm3, %v1758_v47  ;;  %v1937_v51 = vunpack.i.h.bf16 %v1935_v50  ;;  %v1936_v52 = vunpack.i.l.bf16 %v1935_v50 }
 0x248   : > { %1763 = vmatpush3.bf16.xpose.msk.msra.mxu1 %vm2452_vm3, %v1758_v47 }
 0x249   : > { %1766 = vmatprep.subr.msk.bf16.mxu1 %vm2452_vm3, %v1764_v48  ;;  %v1770_v54 = vpack.c.bf16 %v1937_v51, %v1936_v52 }
 0x24a   : > { %v551_v60 = vpop.permute.xlu1 %550 }
 0x24b   : > { %v553_v53 = vpop.permute.xlu0 %552 }
 0x24e   : > { %v555_v61 = vpop.permute.xlu1 %554 }
 0x24f   : > { %v557_v55 = vpop.permute.xlu0 %556 }
 0x250   : > { %1769 = vmatpush3.bf16.xpose.msk.msra.mxu1 %vm2452_vm3, %v1764_v48 }
 0x251   : > { %1772 = vmatprep.subr.msk.bf16.mxu1 %vm2452_vm3, %v1770_v54 }
 0x252   : > { %v559_v62 = vpop.permute.xlu1 %558 }
 0x253   : > { %v542_v56 = vpop.permute.xlu0 %541 }
 0x254   : > { %v544_v57 = vadd.f32 %v542_v56, %v511_v27  ;;  %v545_v58 = vadd.f32 %v1646_v24, %v542_v56 }
 0x256   : > { %v2482_v59 = vpack.i.bf16 %v545_v58, %v544_v57 }
 0x258   : > { %1775 = vmatpush3.bf16.xpose.msk.msra.mxu1 %vm2452_vm3, %v1770_v54 }
 0x25f   : > { %1664 = vmatmul.mubr.msk.f32.vlgmr.msra.gmra.mrb[0].mxu1 %vm604_vm2, %v2444_v25 }
 0x260   : > { %1666 = vmatprep.mubr.msk.f32.mxu1 %vm604_vm2, %v549_v49 }
 0x263   : > { %1667 = vmatmul.mubr.msk.f32.gmra.mrb[2].mxu1 %vm604_vm2, %v551_v60 }
 0x264   : > { %1669 = vmatprep.mubr.msk.f32.mxu1 %vm604_vm2, %v553_v53 }
 0x267   : > { %1670 = vmatmul.mubr.msk.f32.gmra.mrb[4].mxu1 %vm604_vm2, %v555_v61 }
 0x268   : > { %1672 = vmatprep.mubr.msk.f32.mxu1 %vm604_vm2, %v557_v55 }
 0x26b   : > { %1673 = vmatmul.mubr.msk.f32.gmra.mrb[6].mxu1 %vm604_vm2, %v559_v62 }
 0x332   : > { %v1665_v63 = vpop.f32.mrb[0].mxu1 }
 0x333   : > { %v743_v1 = vmul.f32 0.35355338, %v1665_v63  ;;  %v703_v2 = vpop.f32.mrb[1].mxu1 }
 0x334   : > { %v742_v4 = vmul.f32 0.35355338, %v703_v2 }
 0x335   : > { %v759_v5 = vadd.f32 %v751_v0, %v743_v1 }
 0x336   : > { %v1668_v6 = vpop.f32.mrb[2].mxu1  ;;  %v758_v7 = vadd.f32 %v750_v3, %v742_v4 }
 0x337   : > { %v745_v9 = vmul.f32 0.35355338, %v1668_v6  ;;  %v713_v10 = vpop.f32.mrb[3].mxu1  ;;  %v770_v11 = vsel %vm766_vm4, %v759_v5, -inf }
 0x338   : > { %v744_v13 = vmul.f32 0.35355338, %v713_v10  ;;  %771 = vmax.xlane.f32.xlu0 %v770_v11  ;;  %v767_v15 = vsel %vm766_vm4, %v758_v7, -inf }
 0x339   : > { %768 = vmax.xlane.f32.xlu1 %v767_v15  ;;  %v761_v18 = vadd.f32 %v753_v8, %v745_v9 }
 0x33a   : > { %v1671_v19 = vpop.f32.mrb[4].mxu1  ;;  %v760_v21 = vadd.f32 %v752_v12, %v744_v13 }
 0x33b   : > { %v747_v23 = vmul.f32 0.35355338, %v1671_v19  ;;  %v723_v24 = vpop.f32.mrb[5].mxu1  ;;  %v776_v25 = vsel %vm766_vm4, %v761_v18, -inf }
 0x33c   : > { %v746_v27 = vmul.f32 0.35355338, %v723_v24  ;;  %v773_v28 = vsel %vm766_vm4, %v760_v21, -inf }
 0x33d   : > { %777 = vmax.xlane.f32.xlu1 %v776_v25  ;;  %774 = vmax.xlane.f32.xlu0 %v773_v28  ;;  %v763_v29 = vadd.f32 %v755_v22, %v747_v23 }
 0x33e   : > { %v1674_v30 = vpop.f32.mrb[6].mxu1  ;;  %v762_v31 = vadd.f32 %v754_v26, %v746_v27 }
 0x33f   : > { %v749_v33 = vmul.f32 0.35355338, %v1674_v30  ;;  %v733_v34 = vpop.f32.mrb[7].mxu1  ;;  %v782_v35 = vsel %vm766_vm4, %v763_v29, -inf }
 0x340   : > { %v748_v37 = vmul.f32 0.35355338, %v733_v34  ;;  %v779_v38 = vsel %vm766_vm4, %v762_v31, -inf }
 0x341   : > { %783 = vmax.xlane.f32.xlu1 %v782_v35  ;;  %780 = vmax.xlane.f32.xlu0 %v779_v38  ;;  %v765_v39 = vadd.f32 %v757_v32, %v749_v33 }
 0x342   : > { %v764_v40 = vadd.f32 %v756_v36, %v748_v37 }
 0x343   : > { %v788_v41 = vsel %vm766_vm4, %v765_v39, -inf }
 0x344   : > { %v785_v42 = vsel %vm766_vm4, %v764_v40, -inf }
 0x345   : > { %789 = vmax.xlane.f32.xlu1 %v788_v41  ;;  %786 = vmax.xlane.f32.xlu0 %v785_v42 }
 0x356   : > { %1944 = vrot.lane.b32.xlu1 %v2482_v59, %s2179_s14  ;;  %s2184_s14 = smov 8  }
 0x35a   : > { %1949 = vrot.lane.b32.xlu1 %v2482_v59, %s2181_s26 }
 0x35b   : > { %1939 = vrot.lane.b32.xlu0 %v2482_v59, %s2180_s16  ;;  %s2185_s16 = smov 16  }
 0x35e   : > { %1954 = vrot.lane.b32.xlu1 %v2482_v59, %s2183_s27 }
 0x3c5   : > { %v772_v43 = vpop.xlane.xlu0 %771 }
 0x3c6   : > { %v792_v44 = vsub.f32 %v759_v5, %v772_v43  ;;  %v769_v45 = vpop.xlane.xlu1 %768 }
 0x3c7   : > { %v791_v46 = vsub.f32 %v758_v7, %v769_v45 }
 0x3c8   : > { %v801_v47 = vmul.f32 1.442695, %v792_v44 }
 0x3c9   : > { %v799_v48 = vmul.f32 1.442695, %v791_v46 }
 0x3ca   : > { %1973 = vpow2.f32 %v801_v47  ;;  %v778_v49 = vpop.xlane.xlu1 %777  ;;  %v775_v50 = vpop.xlane.xlu0 %774 }
 0x3cb   : > { %1975 = vpow2.f32 %v799_v48  ;;  %v794_v51 = vsub.f32 %v761_v18, %v778_v49  ;;  %v793_v52 = vsub.f32 %v760_v21, %v775_v50 }
 0x3cd   : > { %v805_v53 = vmul.f32 1.442695, %v794_v51  ;;  %v803_v54 = vmul.f32 1.442695, %v793_v52 }
 0x3ce   : > { %v784_v55 = vpop.xlane.xlu1 %783  ;;  %v781_v56 = vpop.xlane.xlu0 %780 }
 0x3cf   : > { %1977 = vpow2.f32 %v805_v53  ;;  %v796_v57 = vsub.f32 %v763_v29, %v784_v55  ;;  %v795_v58 = vsub.f32 %v762_v31, %v781_v56 }
 0x3d0   : > { %1979 = vpow2.f32 %v803_v54 }
 0x3d1   : > { %v809_v59 = vmul.f32 1.442695, %v796_v57  ;;  %v807_v60 = vmul.f32 1.442695, %v795_v58 }
 0x3d2   : > { %v790_v61 = vpop.xlane.xlu1 %789  ;;  %v787_v62 = vpop.xlane.xlu0 %786 }
 0x3d3   : > { %v798_v63 = vsub.f32 %v765_v39, %v790_v61  ;;  %1981 = vpow2.f32 %v807_v60  ;;  %v797_v3 = vsub.f32 %v764_v40, %v787_v62 }
 0x3d4   : > { %v2534_v0 = vpop.eup %1973  ;;  %1983 = vpow2.f32 %v809_v59 }
 0x3d5   : > { %v1976_v1 = vpop.eup %1975  ;;  %v813_v2 = vmul.f32 1.442695, %v798_v63  ;;  %v818_v4 = vsel %vm766_vm4, %v2534_v0, 0.0  ;;  %v811_v8 = vmul.f32 1.442695, %v797_v3  ;;  %v1041_v3 = vld [vmem:[%s2416_s10 + $0x8] sm:$0xff] }
 0x3d6   : > { %819 = vadd.xlane.f32.xlu1 %v818_v4  ;;  %v1945_v5 = vpop.permute.xlu1 %1944  ;;  %v815_v6 = vsel %vm766_vm4, %v1976_v1, 0.0  ;;  %v1940_v29 = vpop.permute.xlu0 %1939 }
 0x3d7   : > { %816 = vadd.xlane.f32.xlu0 %v815_v6  ;;  %1985 = vpow2.f32 %v813_v2  ;;  %v1040_v2 = vld [vmem:[%s2416_s10] sm:$0xff]  ;;  %v1043_v6 = vld [vmem:[%s2416_s10 + $0x18] sm:$0xff] }
 0x3d8   : > { %1987 = vpow2.f32 %v811_v8  ;;  %v1792_v4 = vpack.c.bf16 %v1041_v3, %v1040_v2 }
 0x3d9   : > { %v2539_v7 = vpop.eup %1977 }
 0x3da   : > { %v1950_v9 = vpop.permute.xlu1 %1949  ;;  %v824_v10 = vsel %vm766_vm4, %v2539_v7, 0.0  ;;  %v2543_v11 = vpop.eup %1979 }
 0x3db   : > { %825 = vadd.xlane.f32.xlu0 %v824_v10  ;;  %v821_v15 = vsel %vm766_vm4, %v2543_v11, 0.0 }
 0x3dd   : > { %v2545_v12 = vpop.eup %1981 }
 0x3de   : > { %v1955_v13 = vpop.permute.xlu1 %1954  ;;  %v2549_v18 = vpop.eup %1983  ;;  %v827_v22 = vsel %vm766_vm4, %v2545_v12, 0.0 }
 0x3df   : > { %v1957_v19 = vunpack.i.h.bf16 %v1955_v13  ;;  %v1956_v21 = vunpack.i.l.bf16 %v1955_v13  ;;  %822 = vadd.xlane.f32.xlu0 %v821_v15  ;;  %828 = vadd.xlane.f32.xlu1 %v827_v22  ;;  %v830_v24 = vsel %vm766_vm4, %v2549_v18, 0.0 }
 0x3e1   : > { %v1776_v23 = vpack.c.bf16 %v1957_v19, %v1956_v21  ;;  %v2555_v25 = vpop.eup %1985 }
 0x3e2   : > { %v836_v26 = vsel %vm766_vm4, %v2555_v25, 0.0  ;;  %v1988_v27 = vpop.eup %1987 }
 0x3e3   : > { %1777 = vmatprep.subr.bf16.mxu0 %v1776_v23  ;;  %831 = vadd.xlane.f32.xlu0 %v830_v24  ;;  %v833_v28 = vsel %vm766_vm4, %v1988_v27, 0.0 }
 0x3e4   : > { %1779 = vmatpush3.bf16.msra.mxu0 %v1776_v23 }
 0x3e7   : > { %837 = vadd.xlane.f32.xlu0 %v836_v26 }
 0x3eb   : > { %834 = vadd.xlane.f32.xlu0 %v833_v28 }
 0x3f0   : > { %1964 = vrot.lane.b32.xlu1 %v1945_v5, %s2183_s27  ;;  %v1042_v5 = vld [vmem:[%s2416_s10 + $0x10] sm:$0xff]  ;;  %s2186_s10 = smov 24  }
 0x3f4   : > { %1969 = vrot.lane.b32.xlu1 %v1950_v9, %s2183_s27 }
 0x401   : > { %1959 = vrot.lane.b32.xlu0 %v1940_v29, %s2183_s27 }
 0x463   : > { %v820_v33 = vpop.xlane.xlu1 %819 }
 0x464   : > { %v817_v30 = vpop.xlane.xlu0 %816 }
 0x465   : > { %1989 = vrcp.f32 %v817_v30 }
 0x466   : > { %1991 = vrcp.f32 %v820_v33 }
 0x468   : > { %v826_v31 = vpop.xlane.xlu0 %825 }
 0x46c   : > { %v823_v32 = vpop.xlane.xlu0 %822  ;;  %v829_v37 = vpop.xlane.xlu1 %828 }
 0x46d   : > { %1993 = vrcp.f32 %v823_v32  ;;  %v1046_v32 = vsub.s32 4, %v2432_v16 }
 0x46e   : > { %1995 = vrcp.f32 %v826_v31 }
 0x46f   : > { %v1990_v34 = vpop.eup %1989  ;;  %1997 = vrcp.f32 %v829_v37  ;;  %v1047_v33 = vrot.slane %v2434_v17, %v1046_v32 }
 0x470   : > { %v832_v35 = vpop.xlane.xlu0 %831  ;;  %v840_v36 = vmul.f32 %v1990_v34, %v1976_v1  ;;  %v1965_v39 = vpop.permute.xlu1 %1964 }
 0x471   : > { %v1967_v42 = vunpack.i.h.bf16 %v1965_v39  ;;  %v1966_v43 = vunpack.i.l.bf16 %v1965_v39  ;;  %1999 = vrcp.f32 %v832_v35  ;;  %v1992_v52 = vpop.eup %1991 }
 0x472   : > { %1691 = vmatprep.mubr.msk.f32.mxu0 %vm766_vm4, %v840_v36  ;;  %v842_v54 = vmul.f32 %v1992_v52, %v2534_v0 }
 0x473   : > { %v1784_v48 = vpack.c.bf16 %v1967_v42, %v1966_v43 }
 0x474   : > { %v838_v38 = vpop.xlane.xlu0 %837  ;;  %v1970_v46 = vpop.permute.xlu1 %1969 }
 0x475   : > { %v1972_v49 = vunpack.i.h.bf16 %v1970_v46  ;;  %v1971_v50 = vunpack.i.l.bf16 %v1970_v46 }
 0x477   : > { %v1788_v51 = vpack.c.bf16 %v1972_v49, %v1971_v50  ;;  %v1994_v53 = vpop.eup %1993  ;;  %v1170_v50 = vld [vmem:[%s2402_s25] sm:$0xff] }
 0x478   : > { %v835_v40 = vpop.xlane.xlu0 %834  ;;  %v1996_v55 = vpop.eup %1995  ;;  %v844_v56 = vmul.f32 %v1994_v53, %v2543_v11  ;;  %v1172_v53 = vld [vmem:[%s2402_s25 + $0x10] sm:$0xff] }
 0x479   : > { %2001 = vrcp.f32 %v835_v40  ;;  %v1998_v57 = vpop.eup %1997  ;;  %v846_v58 = vmul.f32 %v1996_v55, %v2539_v7  ;;  %v1796_v7 = vpack.c.bf16 %v1043_v6, %v1042_v5 }
 0x47a   : > { %2003 = vrcp.f32 %v838_v38  ;;  %v848_v60 = vmul.f32 %v1998_v57, %v2545_v12  ;;  %v1262_v57 = vld [vmem:[%s2421_s15 + $0x8] sm:$0xff] }
 0x47b   : > { %v2000_v59 = vpop.eup %1999 }
 0x47c   : > { %v1960_v41 = vpop.permute.xlu0 %1959  ;;  %v850_v62 = vmul.f32 %v2000_v59, %v2549_v18 }
 0x47d   : > { %v1962_v44 = vunpack.i.h.bf16 %v1960_v41  ;;  %v1961_v45 = vunpack.i.l.bf16 %v1960_v41 }
 0x47f   : > { %v1780_v47 = vpack.c.bf16 %v1962_v44, %v1961_v45 }
 0x481   : > { %1781 = vmatprep.subr.bf16.mxu0 %v1780_v47 }
 0x482   : > { %1783 = vmatpush3.bf16.msra.mxu0 %v1780_v47 }
 0x483   : > { %1785 = vmatprep.subr.bf16.mxu0 %v1784_v48  ;;  %v2002_v61 = vpop.eup %2001 }
 0x484   : > { %v2004_v63 = vpop.eup %2003  ;;  %v852_v0 = vmul.f32 %v2002_v61, %v1988_v27 }
 0x485   : > { %v854_v1 = vmul.f32 %v2004_v63, %v2555_v25  ;;  %v1266_v63 = vld [vmem:[%s2421_s15 + $0x28] sm:$0xff] }
 0x486   : > { %1787 = vmatpush3.bf16.msra.mxu0 %v1784_v48 }
 0x487   : > { %1789 = vmatprep.subr.bf16.mxu0 %v1788_v51 }
 0x48a   : > { %1791 = vmatpush3.bf16.msra.mxu0 %v1788_v51  ;;  %v1171_v51 = vld [vmem:[%s2402_s25 + $0x8] sm:$0xff] }
 0x48b   : > { %1793 = vmatprep.subr.bf16.mxu0 %v1792_v4  ;;  %v1800_v52 = vpack.c.bf16 %v1171_v51, %v1170_v50 }
 0x48d   : > { %1692 = vmatmul.mubr.msk.f32.vlgmr.msra.gmra.mrb[2].mxu0 %vm766_vm4, %v842_v54  ;;  %v1173_v54 = vld [vmem:[%s2402_s25 + $0x18] sm:$0xff]  ;;  %s2187_s25 = smov [#allocation9]  }
 0x48e   : > { %1694 = vmatprep.mubr.msk.f32.mxu0 %vm766_vm4, %v844_v56  ;;  %1795 = vmatpush3.bf16.msra.mxu0 %v1792_v4  ;;  %v1804_v55 = vpack.c.bf16 %v1173_v54, %v1172_v53  ;;  %v1261_v56 = vld [vmem:[%s2421_s15] sm:$0xff] }
 0x48f   : > { %1797 = vmatprep.subr.bf16.mxu0 %v1796_v7  ;;  %v1808_v59 = vpack.c.bf16 %v1262_v57, %v1261_v56 }
 0x491   : > { %1695 = vmatmul.mubr.msk.f32.gmra.mrb[4].mxu0 %vm766_vm4, %v846_v58  ;;  %v1263_v58 = vld [vmem:[%s2421_s15 + $0x10] sm:$0xff]  ;;  %1809 = vmatprep.subr.bf16.mxu1 %v1808_v59 }
 0x492   : > { %1697 = vmatprep.mubr.msk.f32.mxu0 %vm766_vm4, %v848_v60  ;;  %1799 = vmatpush3.bf16.msra.mxu0 %v1796_v7  ;;  %v1264_v60 = vld [vmem:[%s2421_s15 + $0x18] sm:$0xff]  ;;  %v1160_v7 = vsub.s32 5, %v2432_v16 }
 0x493   : > { %1801 = vmatprep.subr.bf16.mxu0 %v1800_v52  ;;  %v1812_v61 = vpack.c.bf16 %v1264_v60, %v1263_v58  ;;  %1811 = vmatpush3.bf16.msra.mxu1 %v1808_v59 }
 0x495   : > { %1698 = vmatmul.mubr.msk.f32.gmra.mrb[6].mxu0 %vm766_vm4, %v850_v62  ;;  %v1265_v62 = vld [vmem:[%s2421_s15 + $0x20] sm:$0xff]  ;;  %1813 = vmatprep.subr.bf16.mxu1 %v1812_v61 }
 0x496   : > { %1700 = vmatprep.mubr.msk.f32.mxu0 %vm766_vm4, %v852_v0  ;;  %v1816_v0 = vpack.c.bf16 %v1266_v63, %v1265_v62 }
 0x497   : > { %1815 = vmatpush3.bf16.msra.mxu1 %v1812_v61 }
 0x498   : > { %1817 = vmatprep.subr.bf16.mxu1 %v1816_v0 }
 0x499   : > { %1701 = vmatmul.mubr.msk.f32.gmra.mrb[8].mxu0 %vm766_vm4, %v854_v1 }
 0x49b   : > { %1819 = vmatpush3.bf16.msra.mxu1 %v1816_v0 }
 0x560   : > { %v1693_v8 = vpop.f32.mrb[2].mxu0 }
 0x561   : > { %v969_v9 = vpop.f32.mrb[3].mxu0 }
 0x564   : > { %v1696_v10 = vpop.f32.mrb[4].mxu0 }
 0x565   : > { %1012 = vrot.lane.b32.xlu1 %v1696_v10, %s2184_s14  ;;  %v979_v11 = vpop.f32.mrb[5].mxu0 }
 0x568   : > { %v1699_v12 = vpop.f32.mrb[6].mxu0 }
 0x569   : > { %1010 = vrot.lane.b32.xlu1 %v979_v11, %s2184_s14  ;;  %v989_v13 = vpop.f32.mrb[7].mxu0 }
 0x56a   : > { %1018 = vrot.lane.b32.xlu0 %v989_v13, %s2185_s16 }
 0x56c   : > { %v1702_v15 = vpop.f32.mrb[8].mxu0 }
 0x56d   : > { %1020 = vrot.lane.b32.xlu1 %v1699_v12, %s2185_s16  ;;  %v999_v18 = vpop.f32.mrb[9].mxu0 }
 0x56e   : > { %1026 = vrot.lane.b32.xlu0 %v999_v18, %s2186_s10 }
 0x571   : > { %1028 = vrot.lane.b32.xlu1 %v1702_v15, %s2186_s10 }
 0x5d7   : > { %v1013_v19 = vpop.permute.xlu1 %1012 }
 0x5d8   : > { %v1033_v28 = vsel %vm604_vm2, %v1693_v8, %v1013_v19  ;;  %v1166_v8 = vsub.s32 6, %v2432_v16 }
 0x5da   : > { %v2611_v12 = vrot.slane %v2434_v17, %v1166_v8 }
 0x5db   : > { %v1011_v21 = vpop.permute.xlu1 %1010 }
 0x5dc   : > { %v1019_v22 = vpop.permute.xlu0 %1018  ;;  %v1032_v23 = vsel %vm604_vm2, %v969_v9, %v1011_v21  ;;  %v2608_v9 = vrot.slane %v2434_v17, %v1160_v7 }
 0x5dd   : > { %v1035_v25 = vsel %vm1034_vm5, %v1032_v23, %v1019_v22  ;;  %v1267_v23 = vld [vmem:[%s2421_s15 + $0x30] sm:$0xff] }
 0x5df   : > { %v1021_v24 = vpop.permute.xlu1 %1020 }
 0x5e0   : > { %v1027_v26 = vpop.permute.xlu0 %1026  ;;  %v1036_v29 = vsel %vm1034_vm5, %v1033_v28, %v1021_v24  ;;  %v1268_v24 = vld [vmem:[%s2421_s15 + $0x38] sm:$0xff]  ;;  %s1396_s15 = sshll.u32 %s2187_s25, 4  ;;  %s1397_s15 = int_to_ptr.vmem [resolvable:$true] %s1396_s15 }
 0x5e1   : > { %v1038_v27 = vsel %vm1037_vm6, %v1035_v25, %v1027_v26  ;;  %v1820_v25 = vpack.c.bf16 %v1268_v24, %v1267_v23  ;;  %v1176_v26 = vsub.s32 0, %v2432_v16  ;;  %s2099_s26 = scalar_lea.vmem %s1397_s15, 256  ;;  %p2106_p10 = scmp.lt.s32.totalorder %s1397_s15, %s1397_s15 }
 0x5e2   : > { %1711 = vmatprep.mubr.msk.f32.mxu0 %vm438_vm1, %v1038_v27  ;;  %p2100_p13 = scmp.ne.s32.totalorder %s1397_s15, %s2099_s26  ;;  %p2107_p0 = scmp.lt.s32.totalorder %s2099_s26, %s2099_s26 }
 0x5e3   : > { %v1029_v30 = vpop.permute.xlu1 %1028  ;;  %1821 = vmatprep.subr.bf16.mxu1 %v1820_v25  ;;  %v1177_v27 = vrot.slane %v2434_v17, %v1176_v26 }
 0x5e4   : > { %v1039_v31 = vsel %vm1037_vm6, %v1036_v29, %v1029_v30  ;;  %1823 = vmatpush3.bf16.msra.mxu1 %v1820_v25  ;;  %p2101_p12 = pnand %p2100_p13, %p1854_p11  ;;  %p2108_p5 = por %p2107_p0, %p2106_p10 }
 0x5e5   : > { %1712 = vmatmul.mubr.msk.f32.vlgmr.msra.gmra.mrb[10].mxu0 %vm438_vm1, %v1039_v31 }
 0x5e6   : > { %1803 = vmatpush3.bf16.msra.mxu0 %v1800_v52  ;;  %p2102_p8 = pneg %p2101_p12 }
 0x5e7   : > { %1805 = vmatprep.subr.bf16.mxu0 %v1804_v55 }
 0x5e8   : > { %p2109_p9 = pnand %p2108_p5, %p2102_p8 }
 0x5ea   : > { %1807 = vmatpush3.bf16.msra.mxu0 %v1804_v55 }
 0x6b8   : > { %v1713_v34 = vpop.f32.mrb[10].mxu0 }
 0x6b9   : > { %v1126_v35 = vadd.f32 %v1713_v34, %v1047_v33  ;;  %v1120_v36 = vpop.f32.mrb[11].mxu0  ;;  %v1271_v34 = vsub.s32 7, %v2432_v16 }
 0x6ba   : > { %v1121_v37 = vadd.f32 %v1120_v36, %v1047_v33 }
 0x6bb   : > { %v1130_v38 = vadd.f32 %v1126_v35, %v2438_v20  ;;  %v1272_v35 = vrot.slane %v2434_v17, %v1271_v34 }
 0x6bc   : > { %v1129_v39 = vadd.f32 %v1121_v37, %v2428_v14 }
 0x6bd   : > { %v1134_v40 = vsel %vm438_vm1, %v1130_v38, 0.0 }
 0x6be   : > { %1135 = vadd.xlane.f32.xlu1 %v1134_v40  ;;  %v1131_v41 = vsel %vm438_vm1, %v1129_v39, 0.0 }
 0x6bf   : > { %1132 = vadd.xlane.f32.xlu0 %v1131_v41 }
 0x74b   : > { %v1136_v42 = vpop.xlane.xlu1 %1135 }
 0x74c   : > { %v1139_v43 = vmul.f32 0.03125, %v1136_v42  ;;  %v1133_v44 = vpop.xlane.xlu0 %1132 }
 0x74d   : > { %v1138_v45 = vmul.f32 0.03125, %v1133_v44 }
 0x74e   : > { %v1141_v46 = vsub.f32 %v1130_v38, %v1139_v43 }
 0x74f   : > { %v1140_v47 = vsub.f32 %v1129_v39, %v1138_v45 }
 0x750   : > { %v1143_v20 = vmul.f32 %v1141_v46, %v1141_v46 }
 0x751   : > { %v1142_v48 = vmul.f32 %v1140_v47, %v1140_v47 }
 0x752   : > { %v1147_v49 = vsel %vm438_vm1, %v1143_v20, 0.0 }
 0x753   : > { %v1144_v14 = vsel %vm438_vm1, %v1142_v48, 0.0 }
 0x754   : > { %1145 = vadd.xlane.f32.xlu0 %v1144_v14 }
 0x758   : > { %1148 = vadd.xlane.f32.xlu0 %v1147_v49 }
 0x7e1   : > { %v1146_v1 = vpop.xlane.xlu0 %1145 }
 0x7e2   : > { %v1150_v2 = vmul.f32 0.03125, %v1146_v1 }
 0x7e4   : > { %v1152_v3 = vadd.f32 1e-05, %v1150_v2 }
 0x7e5   : > { %v1149_v4 = vpop.xlane.xlu0 %1148 }
 0x7e6   : > { %2005 = vrsqrt.f32 %v1152_v3  ;;  %v1151_v5 = vmul.f32 0.03125, %v1149_v4 }
 0x7e8   : > { %v1153_v6 = vadd.f32 1e-05, %v1151_v5 }
 0x7ea   : > { %2007 = vrsqrt.f32 %v1153_v6 }
 0x7f0   : > { %v2006_v10 = vpop.eup %2005 }
 0x7f1   : > { %v1156_v11 = vmul.f32 %v2006_v10, %v1140_v47 }
 0x7f3   : > { %v1162_v13 = vmul.f32 %v2608_v9, %v1156_v11 }
 0x7f4   : > { %v2008_v15 = vpop.eup %2007 }
 0x7f5   : > { %v1157_v18 = vmul.f32 %v2008_v15, %v1141_v46  ;;  %v1168_v19 = vadd.f32 %v2611_v12, %v1162_v13 }
 0x7f7   : > { %1722 = vmatprep.mubr.msk.f32.mxu0 %vm438_vm1, %v1168_v19  ;;  %v1163_v21 = vmul.f32 %v2608_v9, %v1157_v18 }
 0x7f9   : > { %v1169_v22 = vadd.f32 %v2611_v12, %v1163_v21 }
 0x7fb   : > { %1723 = vmatmul.mubr.msk.f32.vlgmr.msra.gmra.mrb[12].mxu0 %vm438_vm1, %v1169_v22 }
 0x8ce   : > { %v1724_v28 = vpop.f32.mrb[12].mxu0 }
 0x8cf   : > { %v1256_v29 = vadd.f32 %v1724_v28, %v1177_v27  ;;  %v1250_v30 = vpop.f32.mrb[13].mxu0 }
 0x8d0   : > { %v1251_v31 = vadd.f32 %v1250_v30, %v1177_v27 }
 0x8d1   : > { %v1260_v33 = vmax.f32 %v1256_v29, 0.0 }
 0x8d2   : > { %v1259_v32 = vmax.f32 %v1251_v31, 0.0 }
 0x8d4   : > { %1741 = vmatprep.mubr.msk.f32.mxu1 %vm766_vm4, %v1259_v32 }
 0x8d5   : > { %1742 = vmatmul.mubr.msk.f32.vlgmr.msra.gmra.mrb[8].mxu1 %vm766_vm4, %v1260_v33 }
 0x9a8   : > { %v1743_v36 = vpop.f32.mrb[8].mxu1 }
 0x9a9   : > { %v1351_v37 = vadd.f32 %v1743_v36, %v1272_v35  ;;  %v1345_v38 = vpop.f32.mrb[9].mxu1 }
 0x9aa   : > { %v1346_v39 = vadd.f32 %v1345_v38, %v1272_v35 }
 0x9ab   : > { %v1355_v40 = vadd.f32 %v1351_v37, %v1169_v22 }
 0x9ac   : > { %v1354_v41 = vadd.f32 %v1346_v39, %v1168_v19 }
 0x9ad   : > { %v1359_v42 = vsel %vm438_vm1, %v1355_v40, 0.0 }
 0x9ae   : > { %1360 = vadd.xlane.f32.xlu0 %v1359_v42  ;;  %v1356_v43 = vsel %vm438_vm1, %v1354_v41, 0.0 }
 0x9af   : > { %1357 = vadd.xlane.f32.xlu1 %v1356_v43 }
 0xa3b   : > { %v1361_v44 = vpop.xlane.xlu0 %1360 }
 0xa3c   : > { %v1363_v45 = vmul.f32 0.03125, %v1361_v44  ;;  %v1358_v46 = vpop.xlane.xlu1 %1357 }
 0xa3d   : > { %v1362_v47 = vmul.f32 0.03125, %v1358_v46 }
 0xa3e   : > { %v1365_v48 = vsub.f32 %v1355_v40, %v1363_v45 }
 0xa3f   : > { %v1364_v16 = vsub.f32 %v1354_v41, %v1362_v47 }
 0xa40   : > { %v1367_v14 = vmul.f32 %v1365_v48, %v1365_v48 }
 0xa41   : > { %v1366_v17 = vmul.f32 %v1364_v16, %v1364_v16 }
 0xa42   : > { %v1371_v20 = vsel %vm438_vm1, %v1367_v14, 0.0 }
 0xa43   : > { %1372 = vadd.xlane.f32.xlu0 %v1371_v20  ;;  %v1368_v49 = vsel %vm438_vm1, %v1366_v17, 0.0 }
 0xa44   : > { %1369 = vadd.xlane.f32.xlu1 %v1368_v49 }
 0xad0   : > { %v1373_v50 = vpop.xlane.xlu0 %1372 }
 0xad1   : > { %v1375_v51 = vmul.f32 0.03125, %v1373_v50  ;;  %v1370_v52 = vpop.xlane.xlu1 %1369 }
 0xad2   : > { %v1374_v53 = vmul.f32 0.03125, %v1370_v52 }
 0xad3   : > { %v1377_v54 = vadd.f32 1e-05, %v1375_v51 }
 0xad4   : > { %v1376_v55 = vadd.f32 1e-05, %v1374_v53 }
 0xad5   : > { %2009 = vrsqrt.f32 %v1377_v54 }
 0xad6   : > { %2011 = vrsqrt.f32 %v1376_v55 }
 0xadf   : > { %v2010_v56 = vpop.eup %2009 }
 0xae0   : > { %v2012_v57 = vpop.eup %2011  ;;  %v1381_v58 = vmul.f32 %v2010_v56, %v1365_v48 }
 0xae1   : > { %v1380_v59 = vmul.f32 %v2012_v57, %v1364_v16 }
 0xae2   : > { %v1383_v60 = vmul.f32 %v1381_v58, %v2608_v9 }
 0xae3   : > { %v1382_v61 = vmul.f32 %v1380_v59, %v2608_v9 }
 0xae4   : > { %v1385_v62 = vadd.f32 %v1383_v60, %v2611_v12 }
 0xae5   : > { %v1384_v63 = vadd.f32 %v1382_v61, %v2611_v12 }
 0xae6   : > { %1387 = vst.msk [vmem:[#allocation2 + $0x8] sm:$0xff] %vm438_vm1, %v1385_v62  ;;  %1389 = vst.msk [vmem:[#allocation9 + $0x8] sm:$0xff] %vm438_vm1, %v1385_v62 }
 0xae7   : > { %1386 = vst.msk [vmem:[#allocation2] sm:$0xff] %vm438_vm1, %v1384_v63  ;;  %1388 = vst.msk [vmem:[#allocation9] sm:$0xff] %vm438_vm1, %v1384_v63 }
 0xae8   : > { %2112 = shalt.err (!%p2109_p9)
}
 0xae9   : > { %s2710_s8 = sld [smem:[#allocation16_spill]] }
 0xaef   : > { %s2113_s13 = scalar_lea.hbm %s2710_s8, 256 }
 0xaf0   : > { %p2114_p1 = scmp.ne.s32.totalorder %s2710_s8, %s2113_s13  ;;  %p2119_p2 = scmp.lt.u32.totalorder %s2113_s13, %s2710_s8 }
 0xaf2   : > { %p2115_p3 = pnand %p2114_p1, %p1854_p11 }
 0xaf4   : > { %p2116_p6 = pneg %p2115_p3 }
 0xaf6   : > { %p2121_p4 = pnand %p2119_p2, %p2116_p6 }
 0xaf8   : > { %2124 = shalt.err (!%p2121_p4)
}
 0xaf9   : > { %s2188_s20 = smov 128  }
 0xafa   : > { %1835 = dma.vmem_to_hbm [thread:$0]  (%p1854_p11), %s1397_s15, 256, %s2710_s8, [#allocation5], %s2188_s20, %s2188_s20, %s2184_s14  }
 0xafb   : > { %2154 = dma.done.wait (%p1854_p11), [#allocation5], 256  }
 0xafc   : > { %2156 = vsyncadd (%p1854_p11), [#allocation5], 4294967040 }
 0xafd PF: > { %s2711_s30 = sld [smem:[#allocation14_spill]]  ;;  %s2712_s11 = sld [smem:[#allocation15_spill]] }
 0xafe   : > { %s2713_s27 = smov %s2163_s28  ;;  %s2714_s28 = smov %s2167_s29 }
 0xb03   : > { %p18_p7 = scmp.ge.s32.totalorder %s2711_s30, 4   ;;  %s2715_s29 = smov %s2712_s11 }
 0xb05   :  { %20 = sbr.rel (!%p18_p7) target bundleno = 6 (0x6), region = 112 }
 0xb0c   :  { %1412 = vsyncpa [#allocation4], 1 }
 0xb0d   :  { %1414 = vsyncpa [#allocation4 + $0x1], 1 }
 0xb0e   :  { %1415 = vsyncpa [#allocation7], 1 }
 0xb0f   :  { %1416 = vsyncpa [#allocation5], 1 }
 0xb10   :  { %1418 = vsyncpa [#allocation5 + $0x1], 1 }

</bundles_post_ra>
